<compile_context>
chip_gen: v5e
topology: v5e:2x2
jax: 0.10.0
libtpu: 0.0.40
codegen_flags: <defaults>
</compile_context>

<pallas_src>
import jax
import jax.numpy as jnp
from jax.experimental import pallas as pl
from jax.experimental.pallas import tpu as pltpu


def _conv_bn_kernel(p_ref, w_ref, shift_ref, o_ref):
    """One grid step = one batch element, one MXU matmul.

    p_ref:     (1, K, M)  bf16 im2col patches (K = KH*KW*Cin, M = Hout*Wout)
    w_ref:     (Cout, K)  bf16 conv weights with BN scale folded in
    shift_ref: (Cout, 1)  f32  folded BN shift (beta - mean * scale)
    o_ref:     (1, Cout, M) f32 output (reshapes directly to NCHW outside)
    """
    acc = jnp.dot(w_ref[...], p_ref[0],
                  preferred_element_type=jnp.float32)        # (Cout, M) f32
    o_ref[0] = (acc + shift_ref[...]).astype(o_ref.dtype)     # lane-dense store


def basic_conv2d(x_nchw, weight_oihw, gamma, beta, running_mean, running_var,
                 *, stride=1, padding=0, dilation=1, eps=1e-5):
    """Equivalent of BasicConv2d.forward: bn(conv(x)); NCHW in / NCHW out."""
    N, Cin, H, W = x_nchw.shape
    Cout, Cin_w, KH, KW = weight_oihw.shape
    assert Cin == Cin_w
    Hout = (H + 2 * padding - dilation * (KH - 1) - 1) // stride + 1
    Wout = (W + 2 * padding - dilation * (KW - 1) - 1) // stride + 1
    M = Hout * Wout
    K = KH * KW * Cin

    # --- glue: zero-pad + im2col, kept in NCHW order (no layout transpose) ---
    x_pad = jnp.pad(x_nchw.astype(jnp.float32),
                    ((0, 0), (0, 0), (padding, padding), (padding, padding)))
    taps = []
    for kh in range(KH):
        for kw in range(KW):
            h0 = kh * dilation
            w0 = kw * dilation
            taps.append(x_pad[:, :,
                              h0:h0 + stride * (Hout - 1) + 1:stride,
                              w0:w0 + stride * (Wout - 1) + 1:stride])
    # (N, KH*KW, Cin, Hout, Wout) -> (N, K, M); K index = (kh*KW+kw)*Cin + cin
    patches = jnp.stack(taps, axis=1).reshape(N, K, M).astype(jnp.bfloat16)

    # --- weights: OIHW -> (Cout, KH, KW, Cin) -> (Cout, K); fold BN scale ---
    inv_std = 1.0 / jnp.sqrt(running_var.astype(jnp.float32) + eps)
    scale = gamma.astype(jnp.float32) * inv_std                        # (Cout,)
    shift = (beta.astype(jnp.float32)
             - running_mean.astype(jnp.float32) * scale).reshape(Cout, 1)
    w_mat = (jnp.transpose(weight_oihw, (0, 2, 3, 1))
             .reshape(Cout, K).astype(jnp.float32) * scale[:, None]
             ).astype(jnp.bfloat16)

    out = pl.pallas_call(
        _conv_bn_kernel,
        out_shape=jax.ShapeDtypeStruct((N, Cout, M), jnp.float32),
        grid=(N,),
        in_specs=[
            pl.BlockSpec((1, K, M), lambda n: (n, 0, 0)),
            pl.BlockSpec((Cout, K), lambda n: (0, 0)),
            pl.BlockSpec((Cout, 1), lambda n: (0, 0)),
        ],
        out_specs=pl.BlockSpec((1, Cout, M), lambda n: (n, 0, 0)),
        compiler_params=pltpu.CompilerParams(
            dimension_semantics=("parallel",)),
    )(patches, w_mat, shift)

    return out.reshape(N, Cout, Hout, Wout)   # already NCHW; pure reshape


def _reference(x_nchw, weight_oihw, gamma, beta, running_mean, running_var,
               *, stride, padding, dilation, eps=1e-5):
    conv = jax.lax.conv_general_dilated(
        x_nchw.astype(jnp.float32), weight_oihw.astype(jnp.float32),
        window_strides=(stride, stride),
        padding=[(padding, padding), (padding, padding)],
        rhs_dilation=(dilation, dilation),
        dimension_numbers=("NCHW", "OIHW", "NCHW"),
    )
    g = gamma[None, :, None, None]
    b = beta[None, :, None, None]
    m = running_mean[None, :, None, None]
    v = running_var[None, :, None, None]
    return (conv - m) / jnp.sqrt(v + eps) * g + b


if __name__ == "__main__":
    # Small shapes consistent with the module: BasicConv2d(4, 8, kernel_size=3,
    # stride=1, padding=1) applied to x of shape (2, 4, 16, 16).
    N, Cin, H, W = 2, 4, 16, 16
    Cout, Kk = 8, 3
    stride, padding, dilation = 1, 1, 1

    key = jax.random.PRNGKey(0)
    kx, kw, kg, kb, km, kv = jax.random.split(key, 6)
    x = jax.random.normal(kx, (N, Cin, H, W), dtype=jnp.float32)
    weight = jax.random.normal(kw, (Cout, Cin, Kk, Kk), dtype=jnp.float32) * 0.1
    gamma = 1.0 + 0.1 * jax.random.normal(kg, (Cout,), dtype=jnp.float32)
    beta = 0.1 * jax.random.normal(kb, (Cout,), dtype=jnp.float32)
    running_mean = 0.1 * jax.random.normal(km, (Cout,), dtype=jnp.float32)
    running_var = jax.random.uniform(kv, (Cout,), dtype=jnp.float32,
                                     minval=0.5, maxval=1.5)

    out = basic_conv2d(x, weight, gamma, beta, running_mean, running_var,
                       stride=stride, padding=padding, dilation=dilation)
    out = jax.block_until_ready(out)

    ref = _reference(x, weight, gamma, beta, running_mean, running_var,
                     stride=stride, padding=padding, dilation=dilation)
    assert out.shape == (N, Cout, H, W), out.shape
    assert jnp.allclose(out, ref, atol=5e-2, rtol=5e-2), \
        float(jnp.max(jnp.abs(out - ref)))

    print("KERNEL_OK")
</pallas_src>

<mosaic_0001>
module attributes {stable_mosaic.version = 11 : i64} {
  func.func @_conv_bn_kernel(%arg0: i32, %arg1: memref<1x36x256xbf16, #tpu.memory_space<vmem>>, %arg2: memref<8x36xbf16, #tpu.memory_space<vmem>>, %arg3: memref<8x1xf32, #tpu.memory_space<vmem>>, %arg4: memref<1x8x256xf32, #tpu.memory_space<vmem>>) attributes {dimension_semantics = [#tpu.dimension_semantics<parallel>], iteration_bounds = array<i64: 2>, scalar_prefetch = 0 : i64, scratch_operands = 0 : i64, tpu.core_type = #tpu.core_type<tc>, window_params = [{transform_indices = @transform_0, window_bounds = array<i64: 1, 36, 256>}, {pipeline_mode = #tpu.pipeline_mode<synchronous>, transform_indices = @transform_1, window_bounds = array<i64: 8, 36>}, {pipeline_mode = #tpu.pipeline_mode<synchronous>, transform_indices = @transform_2, window_bounds = array<i64: 8, 1>}, {transform_indices = @transform_3, window_bounds = array<i64: 1, 8, 256>}]} {
    %c0 = arith.constant 0 : index
    %c0_0 = arith.constant 0 : index
    %0 = vector.load %arg2[%c0, %c0_0] : memref<8x36xbf16, #tpu.memory_space<vmem>>, vector<8x36xbf16>
    %c0_1 = arith.constant 0 : index
    %c0_2 = arith.constant 0 : index
    %c0_3 = arith.constant 0 : index
    %1 = vector.load %arg1[%c0_1, %c0_2, %c0_3] : memref<1x36x256xbf16, #tpu.memory_space<vmem>>, vector<1x36x256xbf16>
    %2 = vector.shape_cast %1 : vector<1x36x256xbf16> to vector<36x256xbf16>
    %cst = arith.constant dense<0.000000e+00> : vector<8x256xf32>
    %3 = tpu.matmul %0, %2, %cst {dimension_numbers = #tpu.dot_dimension_numbers<[1], [0], [0], [1], [0, 0, 1, 1], [], []>} : vector<8x36xbf16>, vector<36x256xbf16>, vector<8x256xf32> -> vector<8x256xf32>
    %c0_4 = arith.constant 0 : index
    %c0_5 = arith.constant 0 : index
    %4 = vector.load %arg3[%c0_4, %c0_5] : memref<8x1xf32, #tpu.memory_space<vmem>>, vector<8x1xf32>
    %5 = vector.broadcast %4 : vector<8x1xf32> to vector<8x256xf32>
    %6 = arith.addf %3, %5 : vector<8x256xf32>
    %c0_6 = arith.constant 0 : index
    %c0_7 = arith.constant 0 : index
    %c0_8 = arith.constant 0 : index
    %7 = vector.load %arg4[%c0_6, %c0_7, %c0_8] : memref<1x8x256xf32, #tpu.memory_space<vmem>>, vector<1x8x256xf32>
    %8 = vector.shape_cast %7 : vector<1x8x256xf32> to vector<8x256xf32>
    %9 = vector.shape_cast %6 : vector<8x256xf32> to vector<1x8x256xf32>
    tpu.vector_store %arg4[%c0_6, %c0_7, %c0_8], %9 {strides = array<i32>} : memref<1x8x256xf32, #tpu.memory_space<vmem>>, vector<1x8x256xf32>,
    return
  }
  func.func @transform_0(%arg0: i32) -> (i32, i32, i32) {
    %c0_i32 = arith.constant 0 : i32
    %c0_i32_0 = arith.constant 0 : i32
    %c0_i32_1 = arith.constant 0 : i32
    return %arg0, %c0_i32, %c0_i32_0 : i32, i32, i32
  }
  func.func @transform_1(%arg0: i32) -> (i32, i32) {
    %c0_i32 = arith.constant 0 : i32
    %c0_i32_0 = arith.constant 0 : i32
    %c0_i32_1 = arith.constant 0 : i32
    return %c0_i32, %c0_i32_0 : i32, i32
  }
  func.func @transform_2(%arg0: i32) -> (i32, i32) {
    %c0_i32 = arith.constant 0 : i32
    %c0_i32_0 = arith.constant 0 : i32
    %c0_i32_1 = arith.constant 0 : i32
    return %c0_i32, %c0_i32_0 : i32, i32
  }
  func.func @transform_3(%arg0: i32) -> (i32, i32, i32) {
    %c0_i32 = arith.constant 0 : i32
    %c0_i32_0 = arith.constant 0 : i32
    %c0_i32_1 = arith.constant 0 : i32
    return %arg0, %c0_i32, %c0_i32_0 : i32, i32, i32
  }
}

</mosaic_0001>

<bundles_post_ra>
// kernel: tpu_custom_call.1
= control target key start
LH: loop header
LB: loop body
LE: loop exit
PB: predicated region body
PF: predicated region fallthrough
CT: control target
= control target key end

     0   :  { %8 = vsyncpa [#allocation3], 0  ;;  %s574_s0 = inlined_call_operand.vmem [shape: bf16[2,36,256], index: 0, kind: input, shape index: {}]   ;;  %s575_s1 = inlined_call_operand.vmem [shape: bf16[8,36], index: 1, kind: input, shape index: {}]   ;;  %s576_s2 = inlined_call_operand.vmem [shape: f32[8,1], index: 2, kind: input, shape index: {}]   ;;  %s577_s3 = inlined_call_operand.hbm [shape: f32[2,8,256], index: 3, kind: output, shape index: {}]  }
   0x1   :  { %10 = vsyncpa [#allocation3 + $0x1], 0  ;;  %s483_s12 = smov 0   ;;  %s485_s13 = smov 0  }
   0x2   :  { %s487_s14 = smov 0   ;;  %s489_s15 = smov 0  }
   0x3 LB: > { %s504_s16 = sadd.s32 4294967295, %s460_s15   ;;  %s322_s17 = sadd.s32 4294967294, %s460_s15   ;;  %s460_s15 = sphi %s489_s15, %s583_s15   ;;  %s456_s14 = sphi %s487_s14, %s582_s14   ;;  %s452_s13 = sphi %s485_s13, %s581_s13   ;;  %s448_s12 = sphi %s483_s12, %s580_s12  }
   0x4   : > { %s508_s18 = sadd.s32 1, %s460_s15   ;;  %s91_s19 = sadd.s32 1, %s456_s14 }
   0x5   : > { %s88_s20 = ssub.s32 %s460_s15, %s508_s18  ;;  %p101_p0 = scmp.ne.s32.totalorder %s456_s14, %s452_s13 }
   0x6   : > { %p89_p1 = scmp.eq.s32.totalorder %s88_s20, 0  ;;  %p102_p2 = scmp.eq.s32.totalorder %s504_s16, 1 }
   0x7   : > { %p107_p3 = scmp.ne.s32.totalorder %s452_s13, %s448_s12  ;;  %p108_p4 = scmp.eq.s32.totalorder %s322_s17, 1 }
   0x8   : > { %s519_s21 = scalar_select %p89_p1, %s456_s14, %s91_s19  }
   0x9   : > { %p521_p5 = por %p102_p2, %p101_p0  ;;  %p525_p6 = por %p108_p4, %p107_p3 }
   0xa   : > { %p325_p7 = scmp.ge.s32.totalorder %s460_s15, 1  ;;  %p140_p8 = scmp.lt.s32.totalorder %s460_s15, 3 }
   0xc   : > { %p141_p9 = pnand %p325_p7, %p140_p8 }
   0xd   : > { %p164_p10 = scmp.lt.s32.totalorder (!%p141_p9), %s504_s16, 1  ;;  %s161_s6 = sand.u32 (!%p141_p9), 1, %s452_s13  }
   0xe   : > { %144 = sbr.rel (%p141_p9) target bundleno = 175 (0xaf), region = 32  ;;  %s355_s7 = sshll.u32 (!%p141_p9), %s504_s16, 4 }
   0xf   : > { %s326_s8 = sshll.u32 (!%p141_p9), %s161_s6, 4  ;;  %s258_s11 = scalar_lea.hbm (!%p141_p9), %s577_s3, %s355_s7 }
  0x10   : > { %s163_s17 = scalar_lea.vmem (!%p141_p9), [#allocation2], %s326_s8  ;;  %s262_s20 = sshll.u32 (!%p141_p9), %s258_s11, 4  ;;  %s263_s20 = int_to_ptr.hbm [resolvable:$true] %s262_s20 }
  0x11   : > { %s260_s19 = sshll.u32 (!%p141_p9), %s163_s17, 4  ;;  %s247_s24 = scalar_lea.sflag (!%p141_p9), [#allocation3], %s161_s6  ;;  %s261_s19 = int_to_ptr.vmem [resolvable:$true] %s260_s19 }
  0x12   : > { %s418_s28 = scalar_lea.hbm (!%p141_p9), %s577_s3, 32 }
  0x13   : > { %v462_v0 = vmov 0   ;;  %v176_v1 = vld [vmem:[%s576_s2] sm:$0xff]  ;;  %s165_s26 = scalar_select %p164_p10, %s504_s16, 1  ;;  %vm211_vm0 = vcmask 1041408   ;;  %vm207_vm1 = vcmask 293888  }
  0x14   : > { %397 = vset.pattern.permute.xlu0 %v462_v0  ;;  %v170_v21 = vld [vmem:[%s575_s1] sm:$0xf]  ;;  %s412_s16 = sshra.s32 %s263_s20, 4  ;;  %s413_s16 = int_to_ptr.hbm [resolvable:$true] %s412_s16 }
  0x15   : > { %179 = vperm.xlu0 %397, %v176_v1   ;;  %s356_s27 = smul.u32 40, %s165_s26  ;;  %s414_s25 = scalar_lea.hbm %s413_s16, 16 }
  0x16   : > { %p415_p11 = scmp.ne.s32.totalorder %s413_s16, %s414_s25  ;;  %p419_p0 = scmp.lt.s32.totalorder %s413_s16, %s577_s3 }
  0x17   : > { %s168_s30 = scalar_lea.vmem %s574_s0, %s356_s27  ;;  %p420_p1 = scmp.lt.s32.totalorder %s418_s28, %s414_s25 }
  0x18   : > { %v175_v2 = vld [vmem:[%s168_s30 + $0x20] sm:$0x33]  ;;  %v338_v5 = vld [vmem:[%s168_s30 + $0x10] sm:$0xf]  ;;  %v354_v8 = vld [vmem:[%s168_s30 + $0x14] sm:$0xf0]  ;;  %p416_p12 = pnand %p415_p11, %p521_p5 }
  0x19   : > { %v195_v3 = vunpack.c.l.b16 %v175_v2  ;;  %v196_v4 = vunpack.c.h.b16 %v175_v2  ;;  %v353_v9 = vld [vmem:[%s168_s30 + $0x14] sm:$0xf]  ;;  %v340_v10 = vld [vmem:[%s168_s30 + $0x18] sm:$0xf0]  ;;  %v339_v13 = vor.u32 %v354_v8, %v338_v5  ;;  %v330_v15 = vld [vmem:[%s168_s30] sm:$0xf]  ;;  %p421_p2 = por %p420_p1, %p419_p0 }
  0x1a   : > { %v343_v14 = vor.u32 %v353_v9, %v340_v10  ;;  %v352_v16 = vld [vmem:[%s168_s30 + $0x4] sm:$0xf0]  ;;  %v351_v17 = vld [vmem:[%s168_s30 + $0x4] sm:$0xf]  ;;  %v332_v18 = vld [vmem:[%s168_s30 + $0x8] sm:$0xf0]  ;;  %p417_p13 = pneg %p416_p12 }
  0x1b   : > { %v201_v6 = vpack.c.b16 %v195_v3, %v195_v3  ;;  %v202_v7 = vpack.c.b16 %v196_v4, %v196_v4  ;;  %v331_v19 = vor.u32 %v352_v16, %v330_v15  ;;  %v335_v20 = vor.u32 %v351_v17, %v332_v18 }
  0x1c   : > { %p422_p3 = pnand %p421_p2, %p417_p13 }
  0x1d   : > { %v213_v11 = vsel %vm211_vm0, %v201_v6, 0  ;;  %v216_v12 = vsel %vm211_vm0, %v202_v7, 0 }
  0x1e   : > { %223 = vmatpush.bf16.msra.mxu0 %v213_v11  ;;  %236 = vmatpush.bf16.msra.mxu1 %v216_v12 }
  0x22   : > { %224 = vmatpush.bf16.msra.mxu0 %v339_v13  ;;  %237 = vmatpush.bf16.msra.mxu1 %v343_v14 }
  0x26   : > { %225 = vmatpush.bf16.msra.mxu0 %v331_v19  ;;  %238 = vmatpush.bf16.msra.mxu1 %v335_v20 }
  0x29   : > { %344 = vmatmul.msk.bf16.vlgmr.msra.gmra.mxu0 %vm207_vm1, %v170_v21  ;;  %345 = vmatmul.msk.bf16.vlgmr.msra.gmra.mxu1 %vm207_vm1, %v170_v21 }
  0x87   : > { %v180_v22 = vpop.permute.xlu0 %179 }
  0xa6   : > { %v227_v23 = vpop.f32.mrf.mxu0  ;;  %v240_v24 = vpop.f32.mrf.mxu1 }
  0xa7   : > { %v228_v25 = vadd.f32 %v227_v23, %v180_v22  ;;  %v241_v26 = vadd.f32 %v240_v24, %v180_v22 }
  0xa9   : > { %244 = vst [vmem:[%s163_s17] sm:$0xff] %v228_v25 }
  0xaa   : > { %245 = vst [vmem:[%s163_s17 + $0x8] sm:$0xff] %v241_v26 }
  0xab   : > { %425 = shalt.err (!%p422_p3)
}
  0xac   : > { %357 = dma.vmem_to_hbm [thread:$0]  (%p521_p5), %s261_s19, 256, %s263_s20, %s247_s24  }
  0xae   : > { %v229_v27 = vpop.f32.mrf.mxu0  ;;  %v242_v28 = vpop.f32.mrf.mxu1 }
  0xaf PF: > { %p363_p4 = scmp.ge.s32.totalorder %s460_s15, 2  ;;  %s274_s4 = sand.u32 1, %s448_s12  }
  0xb0   : > { %s275_s5 = scalar_lea.sflag [#allocation3], %s274_s4 }
  0xb1   : > { %p360_p7 = pnand %p363_p4, %p525_p6 }
  0xb3   : > { %p361_p8 = pneg %p360_p7 }
  0xb5   : > { %443 = dma.done.wait (%p361_p8), %s275_s5, 256  }
  0xb6   : > { %445 = vsyncadd (%p361_p8), %s275_s5, 4294967040  ;;  %p13_p5 = scmp.ge.s32.totalorder %s508_s18, 4   ;;  %s580_s12 = smov %s452_s13 }
  0xb7   : > { %s581_s13 = smov %s456_s14  ;;  %s582_s14 = smov %s519_s21 }
  0xb8   : > { %s583_s15 = smov %s508_s18  ;;  %15 = sbr.rel (!%p13_p5) target bundleno = 3 (0x3), region = 67 }
  0xbd   :  { %281 = vsyncpa [#allocation3], 1 }
  0xbe   :  { %283 = vsyncpa [#allocation3 + $0x1], 1 }

</bundles_post_ra>
